<compile_context>
chip_gen: v6e
topology: v6e:2x2x1
jax: 0.10.0
libtpu: 0.0.40
codegen_flags: <defaults>
</compile_context>

<pallas_src>
import functools

import jax
import jax.numpy as jnp
from jax.experimental import pallas as pl
from jax.experimental.pallas import tpu as pltpu


def _interp_matrix(in_size: int, out_size: int, scale: float, mode: str) -> jnp.ndarray:
    """Build (out_size, in_size) 1-D interpolation matrix, PyTorch semantics."""
    i = jnp.arange(out_size, dtype=jnp.float32)
    if mode == "nearest":
        # TODO(synk): PyTorch 'nearest' uses floor(i * in/out); exact for integer scales.
        src = jnp.floor(i / scale).astype(jnp.int32)
        src = jnp.clip(src, 0, in_size - 1)
        return jax.nn.one_hot(src, in_size, dtype=jnp.float32)
    elif mode == "bilinear":
        # align_corners=False: src = (i + 0.5) / scale - 0.5, clamped at 0.
        # TODO(synk): for non-integer scale_factor PyTorch may derive the ratio from
        # the realized output size (recompute_scale_factor); integer scales are exact.
        src = (i + 0.5) / scale - 0.5
        src = jnp.maximum(src, 0.0)
        i0 = jnp.floor(src).astype(jnp.int32)
        i0 = jnp.clip(i0, 0, in_size - 1)
        i1 = jnp.clip(i0 + 1, 0, in_size - 1)
        frac = src - i0.astype(jnp.float32)
        w0 = (1.0 - frac)[:, None] * jax.nn.one_hot(i0, in_size, dtype=jnp.float32)
        w1 = frac[:, None] * jax.nn.one_hot(i1, in_size, dtype=jnp.float32)
        return w0 + w1
    else:
        # TODO(synk): bicubic / trilinear / area (antialias) modes not implemented.
        raise NotImplementedError(f"mode={mode}")


def _vmem_capacity_bytes() -> int:
    """Physical VMEM of the current generation (v5e/v6e 128 MiB, v7x 64 MiB/TC)."""
    try:
        return int(pltpu.get_tpu_info().vmem_capacity_bytes)
    except Exception:
        return 64 << 20  # conservative fallback (v7x per-TensorCore)


def _pick_block_channels(B, H, W, Ho, Wo, itemsize, lane_dense, vmem_cap) -> int:
    """Channel-block size Bc: fits the generation's VMEM, keeps blocks pipelineable."""
    budget = vmem_cap * 3 // 4
    # Resident interpolation matrices (BlockSpec double-buffers them; f32 upper bound).
    budget -= 2 * 4 * (W * Wo + Ho * H)
    budget = max(budget, 1 << 20)
    # Per-channel VMEM: double-buffered input + output blocks, plus in-kernel
    # temporaries (W-resized intermediate, its lane-relayout copy, f32 result).
    per_chan = (2 * H * W * itemsize
                + 2 * Ho * Wo * itemsize
                + 4 * (2 * H * Wo + Ho * Wo))
    cap_vmem = max(1, budget // per_chan)
    # Keep input blocks <= ~8 MiB so G stays large enough to pipeline HBM traffic.
    cap_blk = max(1, (8 << 20) // (H * W * itemsize))
    # Bound the static unroll (lane concat / per-channel store loop) in the kernel.
    cap_unroll = min(64, max(1, 2048 // max(Wo, 1))) if lane_dense else 64
    bc = max(1, min(B, cap_vmem, cap_blk, cap_unroll))
    # Keep >= 4 grid steps when the channel count allows it: lets the BlockSpec
    # pipeline overlap read(i+1)/writeback(i-1) with compute(i) and load-balances
    # v7x's two TensorCores via dimension_semantics=("parallel",).
    if B >= 4:
        bc = min(bc, -(-B // 4))
    return bc


def _interp_kernel_slab(x_ref, rwt_ref, rh_ref, o_ref, *, bc, h):
    """Lane-dense path (Wo < 128): output block is an (Ho, Bc*Wo) slab."""
    # x_ref: (1, Bc*H, W); rwt_ref: (W, Wo); rh_ref: (Ho, H); o_ref: (1, Ho, Bc*Wo)
    x = x_ref[0].astype(rwt_ref.dtype)                                   # (Bc*H, W)
    # W-resize: one big MXU GEMM over the whole channel block (M = Bc*H).
    t = jnp.dot(x, rwt_ref[...], preferred_element_type=jnp.float32)     # (Bc*H, Wo)
    t = t.astype(rh_ref.dtype)
    # Fold channels into the lane dim: (Bc*H, Wo) -> (H, Bc*Wo) via sublane-aligned
    # static slices + lane concat (h is a multiple of 8).
    if bc == 1:
        t_h = t
    else:
        t_h = jnp.concatenate([t[c * h:(c + 1) * h, :] for c in range(bc)], axis=-1)
    # H-resize: one 2-D GEMM, N = Bc*Wo (full MXU N, no broadcast of R_h).
    y = jnp.dot(rh_ref[...], t_h, preferred_element_type=jnp.float32)    # (Ho, Bc*Wo)
    o_ref[0] = y.astype(o_ref.dtype)


def _interp_kernel_nchw(x_ref, rwt_ref, rh_ref, o_ref, *, bc, h):
    """Wo >= 128 path: stores are already lane-dense, write (Bc, Ho, Wo) directly."""
    # x_ref: (1, Bc*H, W); o_ref: (1, Bc, Ho, Wo)
    x = x_ref[0].astype(rwt_ref.dtype)
    t = jnp.dot(x, rwt_ref[...], preferred_element_type=jnp.float32)     # (Bc*H, Wo)
    t = t.astype(rh_ref.dtype)
    for c in range(bc):
        y = jnp.dot(rh_ref[...], t[c * h:(c + 1) * h, :],
                    preferred_element_type=jnp.float32)                  # (Ho, Wo)
        o_ref[0, c] = y.astype(o_ref.dtype)


@functools.partial(jax.jit, static_argnames=("scale_factor", "mode", "compute_dtype"))
def interpolate(x: jnp.ndarray, scale_factor: float = 2.0, mode: str = "bilinear",
                compute_dtype=jnp.float32):
    """Pallas equivalent of Interpolate(scale_factor, mode)(x) with NCHW input.

    compute_dtype=jnp.bfloat16 roughly halves MXU time on v6e/v7x (accumulation
    stays f32); default f32 keeps bit-closeness to the f32 reference.
    """
    N, C, H, W = x.shape
    Ho = int(H * scale_factor)
    Wo = int(W * scale_factor)
    B = N * C
    itemsize = jnp.dtype(x.dtype).itemsize
    lane_dense = Wo < 128

    vmem_cap = _vmem_capacity_bytes()
    Bc = _pick_block_channels(B, H, W, Ho, Wo, itemsize, lane_dense, vmem_cap)
    G = pl.cdiv(B, Bc)
    Bpad = G * Bc

    rh = _interp_matrix(H, Ho, scale_factor, mode).astype(compute_dtype)      # (Ho, H)
    rwt = _interp_matrix(W, Wo, scale_factor, mode).T.astype(compute_dtype)   # (W, Wo)

    # Contiguous reshape + (optional) zero pads; no HBM transpose of the input.
    x_flat = x.reshape(B, H, W)
    if Bpad != B:  # non-divisor N*C: pad channels, dropped after the call.
        x_flat = jnp.pad(x_flat, ((0, Bpad - B), (0, 0), (0, 0)))
    Hp = -(-H // 8) * 8  # keep in-kernel slices sublane-aligned
    if Hp != H:
        x_flat = jnp.pad(x_flat, ((0, 0), (0, Hp - H), (0, 0)))
        rh = jnp.pad(rh, ((0, 0), (0, Hp - H)))  # zero cols => padded rows ignored
    x_blk = x_flat.reshape(G, Bc * Hp, W)

    in_specs = [
        pl.BlockSpec((1, Bc * Hp, W), lambda i: (i, 0, 0)),
        pl.BlockSpec((W, Wo), lambda i: (0, 0)),      # resident across the grid
        pl.BlockSpec((Ho, Hp), lambda i: (0, 0)),     # resident across the grid
    ]
    compiler_params = pltpu.CompilerParams(
        dimension_semantics=("parallel",),
        vmem_limit_bytes=int(vmem_cap * 3 // 4),
    )

    if lane_dense:
        kern = functools.partial(_interp_kernel_slab, bc=Bc, h=Hp)
        out = pl.pallas_call(
            kern,
            out_shape=jax.ShapeDtypeStruct((G, Ho, Bc * Wo), x.dtype),
            grid_spec=pltpu.PrefetchScalarGridSpec(
                num_scalar_prefetch=0,
                grid=(G,),
                in_specs=in_specs,
                out_specs=pl.BlockSpec((1, Ho, Bc * Wo), lambda i: (i, 0, 0)),
            ),
            compiler_params=compiler_params,
        )(x_blk, rwt, rh)
        # Final permute to NCHW done once in the wrapper (kernel stores stay lane-dense).
        out = out.reshape(G, Ho, Bc, Wo).transpose(0, 2, 1, 3).reshape(Bpad, Ho, Wo)
    else:
        kern = functools.partial(_interp_kernel_nchw, bc=Bc, h=Hp)
        out = pl.pallas_call(
            kern,
            out_shape=jax.ShapeDtypeStruct((G, Bc, Ho, Wo), x.dtype),
            grid_spec=pltpu.PrefetchScalarGridSpec(
                num_scalar_prefetch=0,
                grid=(G,),
                in_specs=in_specs,
                out_specs=pl.BlockSpec((1, Bc, Ho, Wo), lambda i: (i, 0, 0, 0)),
            ),
            compiler_params=compiler_params,
        )(x_blk, rwt, rh)
        out = out.reshape(Bpad, Ho, Wo)

    if Bpad != B:
        out = out[:B]
    return out.reshape(N, C, Ho, Wo)


def _reference(x, scale_factor, mode):
    """Pure-JAX reference (same separable formulation, no Pallas)."""
    N, C, H, W = x.shape
    Ho, Wo = int(H * scale_factor), int(W * scale_factor)
    rh = _interp_matrix(H, Ho, scale_factor, mode)
    rw = _interp_matrix(W, Wo, scale_factor, mode)
    return jnp.einsum("oh,nchw,pw->ncop", rh, x.astype(jnp.float32), rw).astype(x.dtype)


if __name__ == "__main__":
    key = jax.random.PRNGKey(0)
    x = jax.random.normal(key, (2, 4, 16, 16), dtype=jnp.float32)

    y = interpolate(x, scale_factor=2.0, mode="bilinear")
    jax.block_until_ready(y)

    y_ref = _reference(x, 2.0, "bilinear")
    assert y.shape == (2, 4, 32, 32), y.shape
    assert jnp.allclose(y, y_ref, atol=1e-5, rtol=1e-5), float(jnp.max(jnp.abs(y - y_ref)))

    print("KERNEL_OK")
</pallas_src>

<mosaic_0001>
module attributes {stable_mosaic.version = 11 : i64} {
  func.func @_interp_kernel_slab(%arg0: i32, %arg1: memref<1x32x16xf32, #tpu.memory_space<vmem>>, %arg2: memref<16x32xf32, #tpu.memory_space<vmem>>, %arg3: memref<32x16xf32, #tpu.memory_space<vmem>>, %arg4: memref<1x32x64xf32, #tpu.memory_space<vmem>>) attributes {dimension_semantics = [#tpu.dimension_semantics<parallel>], iteration_bounds = array<i64: 4>, scalar_prefetch = 0 : i64, scratch_operands = 0 : i64, tpu.core_type = #tpu.core_type<tc>, window_params = [{transform_indices = @transform_0, window_bounds = array<i64: 1, 32, 16>}, {pipeline_mode = #tpu.pipeline_mode<synchronous>, transform_indices = @transform_1, window_bounds = array<i64: 16, 32>}, {pipeline_mode = #tpu.pipeline_mode<synchronous>, transform_indices = @transform_2, window_bounds = array<i64: 32, 16>}, {transform_indices = @transform_3, window_bounds = array<i64: 1, 32, 64>}]} {
    %c0 = arith.constant 0 : index
    %c0_0 = arith.constant 0 : index
    %c0_1 = arith.constant 0 : index
    %0 = vector.load %arg1[%c0, %c0_0, %c0_1] : memref<1x32x16xf32, #tpu.memory_space<vmem>>, vector<1x32x16xf32>
    %1 = vector.shape_cast %0 : vector<1x32x16xf32> to vector<32x16xf32>
    %c0_2 = arith.constant 0 : index
    %c0_3 = arith.constant 0 : index
    %2 = vector.load %arg2[%c0_2, %c0_3] : memref<16x32xf32, #tpu.memory_space<vmem>>, vector<16x32xf32>
    %cst = arith.constant dense<0.000000e+00> : vector<32x32xf32>
    %3 = tpu.matmul %1, %2, %cst {dimension_numbers = #tpu.dot_dimension_numbers<[1], [0], [0], [1], [0, 0, 1, 1], [], []>} : vector<32x16xf32>, vector<16x32xf32>, vector<32x32xf32> -> vector<32x32xf32>
    %4 = vector.extract_strided_slice %3 {offsets = [0, 0], sizes = [16, 32], strides = [1, 1]} : vector<32x32xf32> to vector<16x32xf32>
    %5 = vector.extract_strided_slice %3 {offsets = [16, 0], sizes = [16, 32], strides = [1, 1]} : vector<32x32xf32> to vector<16x32xf32>
    %6 = tpu.concatenate %4, %5 in 1 : vector<16x32xf32>, vector<16x32xf32> -> vector<16x64xf32>
    %c0_4 = arith.constant 0 : index
    %c0_5 = arith.constant 0 : index
    %7 = vector.load %arg3[%c0_4, %c0_5] : memref<32x16xf32, #tpu.memory_space<vmem>>, vector<32x16xf32>
    %cst_6 = arith.constant dense<0.000000e+00> : vector<32x64xf32>
    %8 = tpu.matmul %7, %6, %cst_6 {dimension_numbers = #tpu.dot_dimension_numbers<[1], [0], [0], [1], [0, 0, 1, 1], [], []>} : vector<32x16xf32>, vector<16x64xf32>, vector<32x64xf32> -> vector<32x64xf32>
    %c0_7 = arith.constant 0 : index
    %c0_8 = arith.constant 0 : index
    %c0_9 = arith.constant 0 : index
    %9 = vector.load %arg4[%c0_7, %c0_8, %c0_9] : memref<1x32x64xf32, #tpu.memory_space<vmem>>, vector<1x32x64xf32>
    %10 = vector.shape_cast %9 : vector<1x32x64xf32> to vector<32x64xf32>
    %11 = vector.shape_cast %8 : vector<32x64xf32> to vector<1x32x64xf32>
    tpu.vector_store %arg4[%c0_7, %c0_8, %c0_9], %11 {strides = array<i32>} : memref<1x32x64xf32, #tpu.memory_space<vmem>>, vector<1x32x64xf32>,
    return
  }
  func.func @transform_0(%arg0: i32) -> (i32, i32, i32) {
    %c0_i32 = arith.constant 0 : i32
    %c0_i32_0 = arith.constant 0 : i32
    %c0_i32_1 = arith.constant 0 : i32
    return %arg0, %c0_i32, %c0_i32_0 : i32, i32, i32
  }
  func.func @transform_1(%arg0: i32) -> (i32, i32) {
    %c0_i32 = arith.constant 0 : i32
    %c0_i32_0 = arith.constant 0 : i32
    %c0_i32_1 = arith.constant 0 : i32
    return %c0_i32, %c0_i32_0 : i32, i32
  }
  func.func @transform_2(%arg0: i32) -> (i32, i32) {
    %c0_i32 = arith.constant 0 : i32
    %c0_i32_0 = arith.constant 0 : i32
    %c0_i32_1 = arith.constant 0 : i32
    return %c0_i32, %c0_i32_0 : i32, i32
  }
  func.func @transform_3(%arg0: i32) -> (i32, i32, i32) {
    %c0_i32 = arith.constant 0 : i32
    %c0_i32_0 = arith.constant 0 : i32
    %c0_i32_1 = arith.constant 0 : i32
    return %arg0, %c0_i32, %c0_i32_0 : i32, i32, i32
  }
}

</mosaic_0001>

<bundles_post_ra>
// kernel: interpolate.1
= control target key start
LH: loop header
LB: loop body
LE: loop exit
PB: predicated region body
PF: predicated region fallthrough
CT: control target
= control target key end

     0   :  { %8 = vsyncpa [#allocation3], 0  ;;  %s790_s0 = inlined_call_operand.hbm [shape: f32[4,32,16], index: 0, kind: input, shape index: {}]   ;;  %s791_s1 = inlined_call_operand.vmem [shape: f32[16,32], index: 1, kind: input, shape index: {}]   ;;  %s792_s2 = inlined_call_operand.vmem [shape: f32[32,16], index: 2, kind: input, shape index: {}]   ;;  %s793_s3 = inlined_call_operand.vmem [shape: f32[4,32,64], index: 3, kind: output, shape index: {}]  }
   0x1   :  { %10 = vsyncpa [#allocation3 + $0x1], 0  ;;  %s663_s12 = smov 0   ;;  %s665_s13 = smov 0  }
   0x2   :  { %s667_s14 = smov 0   ;;  %s669_s15 = smov 0  }
   0x3 LB: > { %s682_s16 = sadd.s32 4294967295, %s637_s15   ;;  %s685_s17 = sadd.s32 1, %s637_s15   ;;  %s637_s15 = sphi %s669_s15, %s802_s15   ;;  %s633_s14 = sphi %s667_s14, %s801_s14   ;;  %s629_s13 = sphi %s665_s13, %s800_s13   ;;  %s625_s12 = sphi %s663_s12, %s799_s12  }
   0x4   : > { %s20_s18 = ssub.s32 %s637_s15, %s685_s17  ;;  %s23_s19 = sadd.s32 1, %s633_s14 }
   0x5   : > { %p21_p0 = scmp.eq.s32.totalorder %s20_s18, 0  ;;  %p30_p1 = scmp.ne.s32.totalorder %s633_s14, %s629_s13 }
   0x6   : > { %p31_p2 = scmp.eq.s32.totalorder %s637_s15, 0  ;;  %p36_p3 = scmp.ne.s32.totalorder %s629_s13, %s625_s12 }
   0x7   : > { %s695_s20 = scalar_select %p21_p0, %s633_s14, %s23_s19  }
   0x8   : > { %p32_p4 = por %p31_p2, %p30_p1  ;;  %p37_p5 = scmp.eq.s32.totalorder %s682_s16, 0 }
   0x9   : > { %p539_p6 = scmp.lt.s32.totalorder %s637_s15, 4  ;;  %s134_s22 = sand.u32 1, %s633_s14  }
   0xa   : > { %p699_p7 = por %p37_p5, %p36_p3  ;;  %s482_s23 = sshll.u32 %s134_s22, 5 }
   0xb   : > { %s499_s24 = sshll.u32 %s637_s15, 9  ;;  %s138_s28 = scalar_lea.vmem [#allocation2], %s482_s23 }
   0xc   : > { %s795_s21 = scalar_select %p699_p7, 1, 0 }
   0xd   : > { %s708_s27 = scalar_lea.hbm %s790_s0, %s499_s24  ;;  %s145_s29 = sshll.u32 %s138_s28, 4  ;;  %s710_s29 = int_to_ptr.vmem [resolvable:$true] %s145_s29 }
   0xe   : > { %p712_p8 = pnand %p539_p6, %p32_p4  ;;  %s717_s4 = scalar_lea.sflag [#allocation3], %s134_s22 }
   0xf   : > { %s575_s5 = scalar_lea.hbm %s708_s27, 512  ;;  %s580_s8 = scalar_lea.hbm %s790_s0, 2048 }
  0x10   : > { %p576_p10 = scmp.ne.s32.totalorder %s708_s27, %s575_s5  ;;  %p577_p11 = pneg %p712_p8 }
  0x11   : > { %p581_p0 = scmp.lt.s32.totalorder %s708_s27, %s790_s0  ;;  %p582_p1 = scmp.lt.s32.totalorder %s580_s8, %s575_s5 }
  0x12   : > { %p578_p12 = pnand %p577_p11, %p576_p10 }
  0x13   : > { %p583_p2 = por %p582_p1, %p581_p0 }
  0x14   : > { %p579_p13 = pneg %p578_p12 }
  0x16   : > { %p584_p3 = pnand %p583_p2, %p579_p13 }
  0x18   : > { %587 = shalt.err (!%p584_p3)
}
  0x19   : > { %s588_s11 = scalar_lea.vmem %s710_s29, 512  ;;  %s639_s12 = smov [#allocation2]  }
  0x1a   : > { %p589_p4 = scmp.ne.s32.totalorder %s710_s29, %s588_s11  ;;  %s593_s18 = sshll.u32 %s639_s12, 4  ;;  %s594_s18 = int_to_ptr.vmem [resolvable:$false] %s593_s18 }
  0x1b   : > { %s595_s19 = scalar_lea.vmem %s594_s18, 1024  ;;  %p596_p10 = scmp.lt.s32.totalorder %s710_s29, %s594_s18 }
  0x1c   : > { %p591_p5 = pnand %p589_p4, %p577_p11  ;;  %p597_p12 = scmp.lt.s32.totalorder %s595_s19, %s588_s11 }
  0x1e   : > { %p592_p6 = pneg %p591_p5  ;;  %p598_p9 = por %p597_p12, %p596_p10 }
  0x20   : > { %p599_p7 = pnand %p598_p9, %p592_p6 }
  0x22   : > { %602 = shalt.err (!%p599_p7)
}
  0x23   : > { %s640_s22 = smov 128   ;;  %s641_s23 = smov 8  }
  0x24   : > { %538 = dma.hbm_to_vmem [thread:$0]  (!%p712_p8), %s708_s27, 512, %s710_s29, %s717_s4, %s640_s22, %s640_s22, %s641_s23  }
  0x25   : > { %p153_p11 = scmp.lt.s32.totalorder %s637_s15, 5  ;;  %p797_p13 = scmp.ge.s32.totalorder %s637_s15, 1 }
  0x27   : > { %p154_p0 = pnand %p797_p13, %p153_p11 }
  0x28   : > { %s159_s24 = sand.u32 (!%p154_p0), 1, %s629_s13   ;;  %p798_p7 = scmp.ne.s32.totalorder (!%p154_p0), %s795_s21, 0 }
  0x29   : > { %157 = sbr.rel (%p154_p0) target bundleno = 571 (0x23b), region = 32  ;;  %s486_s25 = sshll.u32 (!%p154_p0), %s159_s24, 5 }
  0x2a   : > { %s160_s26 = scalar_lea.sflag (!%p154_p0), [#allocation3], %s159_s24  ;;  %s163_s28 = scalar_lea.vmem (!%p154_p0), [#allocation2], %s486_s25 }
  0x2e   : > { %620 = dma.done.wait (%p798_p7), %s160_s26, 512  }
  0x2f   : > { %622 = vsyncadd (%p798_p7), %s160_s26, 4294966784  ;;  %vm197_vm0 = vcmask 130048   ;;  %v196_v0 = vld [vmem:[%s791_s1 + $0x8] sm:$0xff]  ;;  %v195_v1 = vld [vmem:[%s791_s1] sm:$0xff]  ;;  %s642_s30 = smov 32   ;;  %vm303_vm1 = vcmask 261120  }
  0x30   : > { %v191_v2 = vld [vmem:[%s163_s28] sm:$0xff]  ;;  %513 = vmatprep.subr.mxu0 %v196_v0  ;;  %v192_v3 = vld [vmem:[%s163_s28 + $0x8] sm:$0xff]  ;;  %v193_v4 = vld [vmem:[%s163_s28 + $0x10] sm:$0xff]  ;;  %p186_p8 = scmp.lt.s32.totalorder %s682_s16, 3  ;;  %vm407_vm2 = vcmask 523264  }
  0x31   : > { %517 = vmatprep.mubr.msk.f32.mxu0 %vm197_vm0, %v191_v2  ;;  %514 = vmatpush3.msra.mxu0 %v196_v0  ;;  %v194_v5 = vld [vmem:[%s163_s28 + $0x18] sm:$0xff]  ;;  %v306_v6 = vld [vmem:[%s792_s2] sm:$0xff]  ;;  %v307_v15 = vld [vmem:[%s792_s2 + $0x8] sm:$0xff] }
  0x32   : > { %515 = vmatprep.subr.mxu0 %v195_v1  ;;  %527 = vmatprep.mubr.msk.f32.mxu1 %vm197_vm0, %v306_v6  ;;  %v308_v16 = vld [vmem:[%s792_s2 + $0x10] sm:$0xff]  ;;  %v309_v17 = vld [vmem:[%s792_s2 + $0x18] sm:$0xff]  ;;  %s804_s16 = smov (!%p186_p8, %s682_s16), 3 }
  0x33   : > { %516 = vmatpush3.msra.mxu0 %v195_v1  ;;  %s500_s12 = sshll.u32 %s804_s16, 5 }
  0x34   : > { %518 = vmatmul.mubr.msk.f32.vlgmr.msra.gmra.mxu0 %vm197_vm0, %v192_v3  ;;  %s190_s22 = scalar_lea.vmem %s793_s3, %s500_s12 }
  0x35   : > { %520 = vmatprep.mubr.msk.f32.mxu0 %vm197_vm0, %v193_v4 }
  0x38   : > { %521 = vmatmul.mubr.msk.f32.gmra.mxu0 %vm197_vm0, %v194_v5 }
  0xf4   : > { %v519_v7 = vpop.f32.mrf.mxu0 }
  0xf6   : > { %v276_v8 = vpop.f32.mrf.mxu0 }
  0xf8   : > { %v522_v9 = vpop.f32.mrf.mxu0 }
  0xf9   : > { %299 = vrot.lane.b32.xlu0 %v522_v9, %s642_s30 }
  0xfa   : > { %v286_v10 = vpop.f32.mrf.mxu0 }
  0xfd   : > { %297 = vrot.lane.b32.xlu0 %v286_v10, %s642_s30 }
 0x16b   : > { %v300_v11 = vpop.permute.xlu0 %299 }
 0x16c   : > { %v305_v12 = vsel %vm303_vm1, %v519_v7, %v300_v11 }
 0x16d   : > { %523 = vmatprep.subr.mxu1 %v305_v12 }
 0x16e   : > { %524 = vmatpush3.msra.mxu1 %v305_v12 }
 0x16f   : > { %v298_v13 = vpop.permute.xlu0 %297 }
 0x170   : > { %v304_v14 = vsel %vm303_vm1, %v276_v8, %v298_v13 }
 0x171   : > { %525 = vmatprep.subr.mxu1 %v304_v14 }
 0x172   : > { %526 = vmatpush3.msra.mxu1 %v304_v14 }
 0x173   : > { %528 = vmatmul.mubr.msk.f32.vlgmr.msra.gmra.mxu1 %vm197_vm0, %v307_v15 }
 0x174   : > { %530 = vmatprep.mubr.msk.f32.mxu1 %vm197_vm0, %v308_v16 }
 0x177   : > { %531 = vmatmul.mubr.msk.f32.gmra.mxu1 %vm197_vm0, %v309_v17 }
 0x233   : > { %v529_v18 = vpop.f32.mrf.mxu1 }
 0x234   : > { %409 = vst.msk [vmem:[%s190_s22 + $0x8] sm:$0xff] %vm407_vm2, %v529_v18 }
 0x235   : > { %v388_v19 = vpop.f32.mrf.mxu1 }
 0x236   : > { %408 = vst.msk [vmem:[%s190_s22] sm:$0xff] %vm407_vm2, %v388_v19 }
 0x237   : > { %v532_v20 = vpop.f32.mrf.mxu1 }
 0x238   : > { %411 = vst.msk [vmem:[%s190_s22 + $0x18] sm:$0xff] %vm407_vm2, %v532_v20 }
 0x239   : > { %v398_v21 = vpop.f32.mrf.mxu1 }
 0x23a   : > { %410 = vst.msk [vmem:[%s190_s22 + $0x10] sm:$0xff] %vm407_vm2, %v398_v21 }
 0x23b PF: > { %p13_p9 = scmp.ge.s32.totalorder %s685_s17, 6   ;;  %s799_s12 = smov %s629_s13 }
 0x23c   : > { %s800_s13 = smov %s633_s14  ;;  %s801_s14 = smov %s695_s20 }
 0x23d   : > { %s802_s15 = smov %s685_s17  ;;  %15 = sbr.rel (!%p13_p9) target bundleno = 3 (0x3), region = 72 }
 0x242   :  { %433 = vsyncpa [#allocation3], 1 }
 0x243   :  { %435 = vsyncpa [#allocation3 + $0x1], 1 }

</bundles_post_ra>
